<compile_context>
chip_gen: v6e
topology: v6e:2x2x1
jax: 0.10.0
libtpu: 0.0.40
codegen_flags: <defaults>
</compile_context>

<pallas_src>
import functools

import jax
import jax.numpy as jnp
from jax.experimental import pallas as pl
from jax.experimental.pallas import tpu as pltpu


# ----------------------------- pass 1: per-row statistics ------------------------
def _stats_kernel(feat_ref, stats_ref, *, time_tile, t_total, needs_mask):
    t = pl.program_id(1)

    x = feat_ref[...].astype(jnp.float32)                        # (D, tT), T on lanes
    if needs_mask:  # static flag: only emitted when time_tile does not divide T
        col = jax.lax.broadcasted_iota(jnp.int32, x.shape, 1)
        x = jnp.where(t * time_tile + col < t_total, x, 0.0)

    s = jnp.sum(x, axis=1, keepdims=True)                        # (D, 1) lane reduce
    sq = jnp.sum(x * x, axis=1, keepdims=True)                   # (D, 1)
    part = jnp.concatenate([s, sq], axis=1)                      # (D, 2)

    @pl.when(t == 0)
    def _():
        stats_ref[...] = part

    @pl.when(t != 0)
    def _():
        stats_ref[...] = stats_ref[...] + part


# ----------------------------- pass 2: streaming apply ---------------------------
def _apply_kernel(ss_ref, feat_ref, out_ref):
    x = feat_ref[...].astype(jnp.float32)                        # (D, tT)
    scale = ss_ref[:, 0:1]                                       # (D, 1) -> lane bcast
    shift = ss_ref[:, 1:2]                                       # (D, 1)
    out_ref[...] = (x * scale + shift).astype(out_ref.dtype)


# ----------------------------- wrapper --------------------------------------------
def _vmem_budget():
    """Generation-aware (max_tile_bytes, vmem_limit_bytes)."""
    try:
        cap = int(pltpu.get_tpu_info().vmem_capacity_bytes)
    except Exception:
        cap = 64 * 1024 * 1024  # conservative (v7x-class)
    if cap >= 96 * 1024 * 1024:                       # v5e / v6e: 128 MiB VMEM
        return 8 * 1024 * 1024, 80 * 1024 * 1024
    return 4 * 1024 * 1024, 48 * 1024 * 1024          # v7x: 64 MiB VMEM


def _pick_time_tile(T, D, itemsize, max_tile_bytes):
    """Lane-dense time tile: multiple of 128 (or full T), capped by the VMEM budget."""
    max_cols = max(128, (max_tile_bytes // max(1, D * itemsize)) // 128 * 128)
    if T <= max_cols:
        return T                                      # single full-extent tile
    start = min(max_cols, (T // 128) * 128)
    for cols in range(start, 0, -128):                # largest 128-multiple divisor
        if T % cols == 0:
            return cols
    return max_cols                                   # cdiv grid + masked tail


def cond_batch_norm_1d(feat, cond, w_gamma, b_gamma, w_beta, b_beta, *,
                       eps=1e-5, time_tile=None):
    """feat: (B, D, T), cond: (B, Dv), w_*: (Dv, D), b_*: (1, D) or (D,) -> (B, D, T)."""
    B, D, T = feat.shape
    Bv, Dv = cond.shape
    assert Bv == B, "batch mismatch between feat_matrix and cond_vector"

    itemsize = jnp.dtype(feat.dtype).itemsize
    max_tile_bytes, vmem_limit = _vmem_budget()
    if time_tile is None:
        time_tile = _pick_time_tile(T, D, itemsize, max_tile_bytes)
    assert time_tile == T or time_tile % 128 == 0, \
        "time_tile must be a multiple of 128 (lane-dense) or the full T"

    nT = pl.cdiv(T, time_tile)
    needs_mask = (T % time_tile) != 0
    fbytes = B * T * D * itemsize

    # ---- pass 1: per-batch-row sum / sum-of-squares partials (B, D, 2) ----
    stats_kernel = functools.partial(
        _stats_kernel, time_tile=time_tile, t_total=T, needs_mask=needs_mask)
    stats = pl.pallas_call(
        stats_kernel,
        out_shape=jax.ShapeDtypeStruct((B, D, 2), jnp.float32),
        grid_spec=pltpu.PrefetchScalarGridSpec(
            num_scalar_prefetch=0,
            grid=(B, nT),
            in_specs=[pl.BlockSpec((None, D, time_tile), lambda b, t: (b, 0, t))],
            out_specs=pl.BlockSpec((None, D, 2), lambda b, t: (b, 0, 0)),
        ),
        compiler_params=pltpu.CompilerParams(
            dimension_semantics=("parallel", "arbitrary"),
            vmem_limit_bytes=vmem_limit),
        cost_estimate=pl.CostEstimate(
            flops=int(3 * B * T * D),
            transcendentals=0,
            bytes_accessed=int(fbytes + B * D * 2 * 4)),
    )(feat)

    # ---- per-row scale/shift: tiny XLA ops between the two streaming passes ----
    inv_n = 1.0 / float(B * T)
    total = jnp.sum(stats, axis=0)                                # (D, 2)
    mean = total[:, 0] * inv_n                                    # (D,)
    var = jnp.maximum(total[:, 1] * inv_n - mean * mean, 0.0)     # clamp cancellation
    rstd = jax.lax.rsqrt(var + eps)                               # (D,)

    cond32 = cond.astype(jnp.float32)
    gamma = cond32 @ w_gamma.astype(jnp.float32) \
        + jnp.reshape(b_gamma, (1, D)).astype(jnp.float32)        # (B, D)
    beta = cond32 @ w_beta.astype(jnp.float32) \
        + jnp.reshape(b_beta, (1, D)).astype(jnp.float32)         # (B, D)
    scale = rstd[None, :] * (gamma + 1.0)                         # (B, D)
    shift = beta - mean[None, :] * scale                          # (B, D)
    ss = jnp.stack([scale, shift], axis=-1)                       # (B, D, 2)

    # ---- pass 2: out = feat * scale + shift, native (B, D, T) layout ----
    out = pl.pallas_call(
        _apply_kernel,
        out_shape=jax.ShapeDtypeStruct((B, D, T), feat.dtype),
        grid_spec=pltpu.PrefetchScalarGridSpec(
            num_scalar_prefetch=0,
            grid=(B, nT),
            in_specs=[
                pl.BlockSpec((None, D, 2), lambda b, t: (b, 0, 0)),          # scale/shift
                pl.BlockSpec((None, D, time_tile), lambda b, t: (b, 0, t)),  # feat tile
            ],
            out_specs=pl.BlockSpec((None, D, time_tile), lambda b, t: (b, 0, t)),
        ),
        compiler_params=pltpu.CompilerParams(
            dimension_semantics=("parallel", "parallel"),
            vmem_limit_bytes=vmem_limit),
        cost_estimate=pl.CostEstimate(
            flops=int(2 * B * T * D),
            transcendentals=0,
            bytes_accessed=int(2 * fbytes + B * D * 2 * 4)),
    )(ss, feat)

    return out


# ----------------------------- pure-JAX reference ---------------------------------
def reference(feat, cond, w_gamma, b_gamma, w_beta, b_beta, eps=1e-5):
    mean = jnp.mean(feat, axis=(0, 2), keepdims=True)
    var = jnp.mean((feat - mean) ** 2, axis=(0, 2), keepdims=True)
    norm = (feat - mean) / jnp.sqrt(var + eps)
    gamma = cond @ w_gamma + b_gamma
    beta = cond @ w_beta + b_beta
    return norm * (gamma + 1.0)[:, :, None] + beta[:, :, None]


if __name__ == "__main__":
    # Module config: in_features = 32, cond_vector_size = None -> in_features,
    # groups = 1, nonlinear_proj = False.  time_tile=128 with T=512 forces a
    # (B, 4) grid so the tiled per-row accumulation path is exercised.
    B, D, T = 2, 32, 512
    Dv = D

    key = jax.random.PRNGKey(0)
    k_feat, k_cond, k_wg, k_bg, k_wb, k_bb = jax.random.split(key, 6)

    feat = jax.random.normal(k_feat, (B, D, T), dtype=jnp.float32)
    cond = jax.random.normal(k_cond, (B, Dv), dtype=jnp.float32)

    # PyTorch-style Linear init, weights stored pre-transposed as (Dv, D).
    bound = 1.0 / jnp.sqrt(jnp.float32(Dv))
    w_gamma = jax.random.uniform(k_wg, (Dv, D), jnp.float32, -bound, bound)
    b_gamma = jax.random.uniform(k_bg, (1, D), jnp.float32, -bound, bound)
    w_beta = jax.random.uniform(k_wb, (Dv, D), jnp.float32, -bound, bound)
    b_beta = jax.random.uniform(k_bb, (1, D), jnp.float32, -bound, bound)

    out = cond_batch_norm_1d(feat, cond, w_gamma, b_gamma, w_beta, b_beta,
                             time_tile=128)
    jax.block_until_ready(out)

    ref = reference(feat, cond, w_gamma, b_gamma, w_beta, b_beta)
    assert out.shape == (B, D, T)
    assert jnp.allclose(out, ref, atol=1e-4, rtol=1e-5), "mismatch vs pure-JAX reference"

    print("KERNEL_OK")
</pallas_src>

<mosaic_0001>
module attributes {stable_mosaic.version = 11 : i64} {
  func.func @_stats_kernel(%arg0: i32, %arg1: i32, %arg2: memref<1x32x128xf32, #tpu.memory_space<vmem>>, %arg3: memref<1x32x2xf32, #tpu.memory_space<vmem>>) attributes {dimension_semantics = [#tpu.dimension_semantics<parallel>, #tpu.dimension_semantics<arbitrary>], iteration_bounds = array<i64: 2, 4>, scalar_prefetch = 0 : i64, scratch_operands = 0 : i64, tpu.core_type = #tpu.core_type<tc>, window_params = [{transform_indices = @transform_0, window_bounds = array<i64: 1, 32, 128>}, {transform_indices = @transform_1, window_bounds = array<i64: 1, 32, 2>}]} {
    %c0 = arith.constant 0 : index
    %c0_0 = arith.constant 0 : index
    %c0_1 = arith.constant 0 : index
    %0 = vector.load %arg2[%c0, %c0_0, %c0_1] : memref<1x32x128xf32, #tpu.memory_space<vmem>>, vector<1x32x128xf32>
    %1 = vector.shape_cast %0 : vector<1x32x128xf32> to vector<32x128xf32>
    %cst = arith.constant dense<0.000000e+00> : vector<32xf32>
    %2 = vector.multi_reduction <add>, %1, %cst [1] : vector<32x128xf32> to vector<32xf32>
    %3 = vector.shape_cast %2 : vector<32xf32> to vector<32x1xf32>
    %4 = arith.mulf %1, %1 : vector<32x128xf32>
    %cst_2 = arith.constant dense<0.000000e+00> : vector<32xf32>
    %5 = vector.multi_reduction <add>, %4, %cst_2 [1] : vector<32x128xf32> to vector<32xf32>
    %6 = vector.shape_cast %5 : vector<32xf32> to vector<32x1xf32>
    %7 = tpu.concatenate %3, %6 in 1 : vector<32x1xf32>, vector<32x1xf32> -> vector<32x2xf32>
    %c0_i32 = arith.constant 0 : i32
    %8 = arith.cmpi eq, %arg1, %c0_i32 : i32
    %9 = arith.extui %8 : i1 to i32
    %c0_i32_3 = arith.constant 0 : i32
    %10 = arith.cmpi ne, %9, %c0_i32_3 : i32
    scf.if %10 {
      %c0_6 = arith.constant 0 : index
      %c0_7 = arith.constant 0 : index
      %c0_8 = arith.constant 0 : index
      %14 = vector.load %arg3[%c0_6, %c0_7, %c0_8] : memref<1x32x2xf32, #tpu.memory_space<vmem>>, vector<1x32x2xf32>
      %15 = vector.shape_cast %14 : vector<1x32x2xf32> to vector<32x2xf32>
      %16 = vector.shape_cast %7 : vector<32x2xf32> to vector<1x32x2xf32>
      tpu.vector_store %arg3[%c0_6, %c0_7, %c0_8], %16 {strides = array<i32>} : memref<1x32x2xf32, #tpu.memory_space<vmem>>, vector<1x32x2xf32>,
    } else {
    }
    %c0_i32_4 = arith.constant 0 : i32
    %11 = arith.cmpi ne, %arg1, %c0_i32_4 : i32
    %12 = arith.extui %11 : i1 to i32
    %c0_i32_5 = arith.constant 0 : i32
    %13 = arith.cmpi ne, %12, %c0_i32_5 : i32
    scf.if %13 {
      %c0_6 = arith.constant 0 : index
      %c0_7 = arith.constant 0 : index
      %c0_8 = arith.constant 0 : index
      %14 = vector.load %arg3[%c0_6, %c0_7, %c0_8] : memref<1x32x2xf32, #tpu.memory_space<vmem>>, vector<1x32x2xf32>
      %15 = vector.shape_cast %14 : vector<1x32x2xf32> to vector<32x2xf32>
      %16 = arith.addf %15, %7 : vector<32x2xf32>
      %c0_9 = arith.constant 0 : index
      %c0_10 = arith.constant 0 : index
      %c0_11 = arith.constant 0 : index
      %17 = vector.load %arg3[%c0_9, %c0_10, %c0_11] : memref<1x32x2xf32, #tpu.memory_space<vmem>>, vector<1x32x2xf32>
      %18 = vector.shape_cast %17 : vector<1x32x2xf32> to vector<32x2xf32>
      %19 = vector.shape_cast %16 : vector<32x2xf32> to vector<1x32x2xf32>
      tpu.vector_store %arg3[%c0_9, %c0_10, %c0_11], %19 {strides = array<i32>} : memref<1x32x2xf32, #tpu.memory_space<vmem>>, vector<1x32x2xf32>,
    } else {
    }
    return
  }
  func.func @transform_0(%arg0: i32, %arg1: i32) -> (i32, i32, i32) {
    %c0_i32 = arith.constant 0 : i32
    %c0_i32_0 = arith.constant 0 : i32
    return %arg0, %c0_i32, %arg1 : i32, i32, i32
  }
  func.func @transform_1(%arg0: i32, %arg1: i32) -> (i32, i32, i32) {
    %c0_i32 = arith.constant 0 : i32
    %c0_i32_0 = arith.constant 0 : i32
    %c0_i32_1 = arith.constant 0 : i32
    return %arg0, %c0_i32, %c0_i32_0 : i32, i32, i32
  }
}

</mosaic_0001>

<bundles_post_ra>
// kernel: tpu_custom_call.1
= control target key start
LH: loop header
LB: loop body
LE: loop exit
PB: predicated region body
PF: predicated region fallthrough
CT: control target
= control target key end

     0   :  { %6 = vsyncpa [#allocation3], 0  ;;  %s626_s0 = inlined_call_operand.hbm [shape: f32[2,32,512], index: 0, kind: input, shape index: {}]   ;;  %s627_s1 = inlined_call_operand.vmem [shape: f32[2,32,2], index: 1, kind: output, shape index: {}]  }
   0x1   :  { %8 = vsyncpa [#allocation3 + $0x1], 0  ;;  %s487_s6 = smov 0   ;;  %s489_s7 = smov 0  }
   0x2   :  { %s491_s8 = smov 0   ;;  %s493_s9 = smov 0  }
   0x3   :  { %s495_s10 = smov 0   ;;  %s497_s11 = smov 0  }
   0x4   :  { %s499_s12 = smov 0   ;;  %s501_s13 = smov 0  }
   0x5 LB: > { %s287_s14 = sadd.s32 4294967295, %s471_s13   ;;  %s23_s15 = sadd.s32 1, %s463_s11  ;;  %s471_s13 = sphi %s501_s13, %s14_s13   ;;  %s467_s12 = sphi %s499_s12, %s637_s12   ;;  %s463_s11 = sphi %s497_s11, %s636_s11   ;;  %s459_s10 = sphi %s495_s10, %s635_s10   ;;  %s455_s9 = sphi %s493_s9, %s634_s9   ;;  %s451_s8 = sphi %s491_s8, %s633_s8   ;;  %s447_s7 = sphi %s489_s7, %s632_s7   ;;  %s443_s6 = sphi %s487_s6, %s631_s6  }
   0x6   : > { %p24_p0 = scmp.ge.s32.totalorder %s23_s15, 4  ;;  %s26_s16 = sadd.s32 1, %s467_s12 }
   0x7   : > { %s35_s17 = sadd.s32 1, %s451_s8  ;;  %p42_p1 = scmp.ne.s32.totalorder %s451_s8, %s447_s7 }
   0x8   : > { %s639_s15 = smov (%p24_p0, %s23_s15), 0  ;;  %s641_s16 = smov (!%p24_p0, %s26_s16), %s467_s12 }
   0x9   : > { %s31_s18 = ssub.s32 %s463_s11, %s639_s15  ;;  %p43_p2 = scmp.eq.s32.totalorder %s471_s13, 0 }
   0xa   : > { %p28_p3 = scmp.ge.s32.totalorder %s641_s16, 2  ;;  %p48_p4 = scmp.ne.s32.totalorder %s447_s7, %s443_s6 }
   0xb   : > { %p538_p5 = por %p43_p2, %p42_p1  ;;  %p49_p6 = scmp.eq.s32.totalorder %s287_s14, 0 }
   0xc   : > { %s643_s16 = smov (%p28_p3, %s641_s16), 0  ;;  %p309_p8 = scmp.lt.s32.totalorder %s471_s13, 8 }
   0xd   : > { %p544_p7 = por %p49_p6, %p48_p4  ;;  %s30_s21 = ssub.s32 %s467_s12, %s643_s16 }
   0xe   : > { %s32_s22 = sor.u32 %s31_s18, %s30_s21  ;;  %s98_s23 = sand.u32 1, %s451_s8  }
   0xf   : > { %p33_p9 = scmp.eq.s32.totalorder %s32_s22, 0  ;;  %s291_s24 = sshll.u32 %s98_s23, 5 }
  0x10   : > { %s292_s25 = sshll.u32 %s467_s12, 4  ;;  %s102_s29 = scalar_lea.vmem [#allocation2], %s291_s24 }
  0x11   : > { %s554_s26 = scalar_select %p33_p9, %s451_s8, %s35_s17  }
  0x12   : > { %s107_s27 = sadd.s32 %s463_s11, %s292_s25  ;;  %s110_s30 = sshll.u32 %s102_s29, 4  ;;  %s111_s30 = int_to_ptr.vmem [resolvable:$true] %s110_s30 }
  0x13   : > { %s293_s28 = sshll.u32 %s107_s27, 7  ;;  %p564_p10 = pnand %p309_p8, %p538_p5 }
  0x14   : > { %s109_s4 = scalar_lea.hbm %s626_s0, %s293_s28  ;;  %p294_p11 = scmp.ge.s32.totalorder %s471_s13, 1 }
  0x15   : > { %s99_s6 = scalar_lea.sflag [#allocation3], %s98_s23  ;;  %p379_p12 = pneg %p564_p10 }
  0x16   : > { %s390_s14 = scalar_lea.vmem %s111_s30, 512  ;;  %s473_s17 = smov [#allocation2]  }
  0x17   : > { %p391_p13 = scmp.ne.s32.totalorder %s111_s30, %s390_s14  ;;  %s395_s18 = sshll.u32 %s473_s17, 4  ;;  %s396_s18 = int_to_ptr.vmem [resolvable:$false] %s395_s18 }
  0x18   : > { %s397_s21 = scalar_lea.vmem %s396_s18, 1024  ;;  %p398_p2 = scmp.lt.s32.totalorder %s111_s30, %s396_s18 }
  0x19   : > { %p393_p0 = pnand %p391_p13, %p379_p12  ;;  %p399_p3 = scmp.lt.s32.totalorder %s397_s21, %s390_s14 }
  0x1b   : > { %p394_p1 = pneg %p393_p0  ;;  %p400_p4 = por %p399_p3, %p398_p2 }
  0x1d   : > { %p401_p5 = pnand %p400_p4, %p394_p1 }
  0x1f   : > { %404 = shalt.err (!%p401_p5)
}
  0x20   : > { %s474_s19 = smov 512   ;;  %s475_s22 = smov 128  }
  0x21   : > { %s476_s23 = smov 8   ;;  %p118_p6 = scmp.lt.s32.totalorder %s471_s13, 9 }
  0x22   : > { %308 = dma.hbm_to_vmem [thread:$0]  (!%p564_p10), %s109_s4, 512, %s111_s30, %s99_s6, %s474_s19, %s475_s22, %s476_s23  }
  0x23   : > { %p119_p8 = pnand %p294_p11, %p118_p6 }
  0x24   : > { %s124_s24 = sand.u32 (!%p119_p8), 1, %s447_s7  }
  0x25   : > { %122 = sbr.rel (%p119_p8) target bundleno = 210 (0xd2), region = 24  ;;  %s295_s25 = sshll.u32 (!%p119_p8), %s124_s24, 5 }
  0x26   : > { %s125_s27 = scalar_lea.sflag (!%p119_p8), [#allocation3], %s124_s24  ;;  %s128_s28 = scalar_lea.vmem (!%p119_p8), [#allocation2], %s295_s25 }
  0x2a   : > { %438 = dma.done.wait (%p544_p7), %s125_s27, 512  }
  0x2b   : > { %440 = vsyncadd (%p544_p7), %s125_s27, 4294966784  ;;  %v154_v0 = vld [vmem:[%s128_s28 + $0x10] sm:$0xff]  ;;  %v152_v1 = vld [vmem:[%s128_s28] sm:$0xff]  ;;  %p147_p9 = scmp.lt.s32.totalorder %s459_s10, 1  ;;  %vm176_vm0 = vcmask 7168   ;;  %p298_p7 = scmp.ne.s32.totalorder %s455_s9, 0 }
  0x2c   : > { %160 = vadd.xlane.f32.xlu1 %v154_v0  ;;  %156 = vadd.xlane.f32.xlu0 %v152_v1  ;;  %v155_v2 = vld [vmem:[%s128_s28 + $0x18] sm:$0xff]  ;;  %v153_v3 = vld [vmem:[%s128_s28 + $0x8] sm:$0xff]  ;;  %v164_v5 = vmul.f32 %v152_v1, %v152_v1  ;;  %v166_v7 = vmul.f32 %v154_v0, %v154_v0 }
  0x2d   : > { %v165_v4 = vmul.f32 %v153_v3, %v153_v3  ;;  %v167_v6 = vmul.f32 %v155_v2, %v155_v2  ;;  %s645_s10 = smov (!%p147_p9, %s459_s10), 1 }
  0x2e   : > { %s302_s20 = sshll.u32 %s645_s10, 5 }
  0x2f   : > { %s586_s2 = scalar_lea.vmem %s627_s1, %s302_s20 }
  0x30   : > { %162 = vadd.xlane.f32.xlu1 %v155_v2  ;;  %158 = vadd.xlane.f32.xlu0 %v153_v3 }
  0x34   : > { %170 = vadd.xlane.f32.xlu1 %v165_v4  ;;  %168 = vadd.xlane.f32.xlu0 %v164_v5 }
  0x38   : > { %174 = vadd.xlane.f32.xlu1 %v167_v6  ;;  %172 = vadd.xlane.f32.xlu0 %v166_v7 }
  0xb5   : > { %v161_v8 = vpop.xlane.xlu1 %160  ;;  %v157_v9 = vpop.xlane.xlu0 %156 }
  0xb9   : > { %v163_v10 = vpop.xlane.xlu1 %162  ;;  %v159_v11 = vpop.xlane.xlu0 %158 }
  0xbd   : > { %v171_v12 = vpop.xlane.xlu1 %170  ;;  %v169_v13 = vpop.xlane.xlu0 %168 }
  0xbe   : > { %v178_v14 = vsel %vm176_vm0, %v159_v11, %v171_v12  ;;  %v177_v15 = vsel %vm176_vm0, %v157_v9, %v169_v13  ;;  %184 = sbr.rel (%p298_p7) target bundleno = 198 (0xc6), region = 32 }
  0xc1   : > { %v175_v16 = vpop.xlane.xlu1 %174  ;;  %v173_v17 = vpop.xlane.xlu0 %172 }
  0xc2   : > { %v180_v18 = vsel %vm176_vm0, %v163_v10, %v175_v16  ;;  %v179_v19 = vsel %vm176_vm0, %v161_v8, %v173_v17 }
  0xc3   : > { %vm185_vm1 = vcmask 15360  }
  0xc4   : > { %186 = vst.msk [vmem:[%s586_s2] sm:$0xff] %vm185_vm1, %v177_v15  ;;  %187 = vst.msk [vmem:[%s586_s2 + $0x8] sm:$0xff] %vm185_vm1, %v178_v14 }
  0xc5   : > { %188 = vst.msk [vmem:[%s586_s2 + $0x10] sm:$0xff] %vm185_vm1, %v179_v19  ;;  %189 = vst.msk [vmem:[%s586_s2 + $0x18] sm:$0xff] %vm185_vm1, %v180_v18 }
  0xc6 PF: > { %p299_p10 = scmp.eq.s32.totalorder %s455_s9, 0 }
  0xc8   : > { %193 = sbr.rel (%p299_p10) target bundleno = 210 (0xd2), region = 36 }
  0xcd   : > { %v194_v20 = vld [vmem:[%s586_s2] sm:$0xff]  ;;  %vm202_vm2 = vcmask 15360   ;;  %v195_v21 = vld [vmem:[%s586_s2 + $0x8] sm:$0xff]  ;;  %v196_v22 = vld [vmem:[%s586_s2 + $0x10] sm:$0xff] }
  0xce   : > { %v198_v23 = vadd.f32 %v194_v20, %v177_v15  ;;  %v199_v24 = vadd.f32 %v195_v21, %v178_v14  ;;  %v200_v25 = vadd.f32 %v196_v22, %v179_v19  ;;  %v197_v26 = vld [vmem:[%s586_s2 + $0x18] sm:$0xff] }
  0xcf   : > { %v201_v27 = vadd.f32 %v197_v26, %v180_v18 }
  0xd0   : > { %203 = vst.msk [vmem:[%s586_s2] sm:$0xff] %vm202_vm2, %v198_v23  ;;  %204 = vst.msk [vmem:[%s586_s2 + $0x8] sm:$0xff] %vm202_vm2, %v199_v24 }
  0xd1   : > { %205 = vst.msk [vmem:[%s586_s2 + $0x10] sm:$0xff] %vm202_vm2, %v200_v25  ;;  %206 = vst.msk [vmem:[%s586_s2 + $0x18] sm:$0xff] %vm202_vm2, %v201_v27 }
  0xd2 PF: > { %s14_s13 = sadd.s32 1, %s471_s13   ;;  %s631_s6 = smov %s447_s7 }
  0xd3   : > { %p11_p11 = scmp.ge.s32.totalorder %s14_s13, 10   ;;  %s632_s7 = smov %s451_s8 }
  0xd4   : > { %s633_s8 = smov %s554_s26  ;;  %s634_s9 = smov %s463_s11 }
  0xd5   : > { %s635_s10 = smov %s467_s12  ;;  %s636_s11 = smov %s639_s15 }
  0xd6   : > { %s637_s12 = smov %s643_s16  ;;  %13 = sbr.rel (!%p11_p11) target bundleno = 5 (0x5), region = 72 }
  0xdb   :  { %228 = vsyncpa [#allocation3], 1 }
  0xdc   :  { %230 = vsyncpa [#allocation3 + $0x1], 1 }

</bundles_post_ra>
